<compile_context>
chip_gen: v7x
topology: tpu7x:2x2x1
jax: 0.10.0
libtpu: 0.0.40
codegen_flags: <defaults>
</compile_context>

<pallas_src>
import functools
import math

import jax
import jax.numpy as jnp
from jax.experimental import pallas as pl
from jax.experimental.pallas import tpu as pltpu


_SQRT1_2 = 1.0 / math.sqrt(2.0)
_VMEM_LIMIT = 48 * 1024 * 1024     # explicit scoped-VMEM budget (fits v5e/v6e/v7x)


def _pick_tile(dim, target):
    """Largest tile <= target that evenly divides `dim`.  Multiples of 128 when
    actually tiling; otherwise the full dimension (single block, which waives
    the (8,128) divisibility constraint)."""
    if dim <= target:
        return dim
    t = (target // 128) * 128
    while t >= 128:
        if dim % t == 0:
            return t
        t -= 128
    return dim


def _heads_per_group(nh, dh):
    """Smallest head-group size whose lane width (hg*dh) is a multiple of 128;
    falls back to all heads in one group for tiny head dims (test config)."""
    for hg in range(1, nh + 1):
        if nh % hg == 0 and (hg * dh) % 128 == 0:
            return hg
    return nh


# ----------------------------- Pallas kernels -----------------------------

def _linear_kernel(x_ref, w_ref, b_ref, o_ref, acc_ref, *, act):
    k = pl.program_id(2)

    @pl.when(k == 0)
    def _():
        acc_ref[...] = jnp.zeros_like(acc_ref)

    acc_ref[...] += jnp.dot(x_ref[...], w_ref[...],
                            preferred_element_type=jnp.float32)

    @pl.when(k == pl.num_programs(2) - 1)
    def _():
        y = acc_ref[...] + b_ref[...]
        if act == "gelu":                      # exact (erf) GELU, as in BERT
            y = 0.5 * y * (1.0 + jax.lax.erf(y * _SQRT1_2))
        elif act == "gelu_tanh":               # EUP-friendly approximation (flag)
            y = 0.5 * y * (1.0 + jnp.tanh(0.7978845608028654
                                          * (y + 0.044715 * y * y * y)))
        elif act == "tanh":
            y = jnp.tanh(y)
        o_ref[...] = y.astype(o_ref.dtype)


def linear(x2d, w, b, act="none", out_dtype=jnp.bfloat16,
           tm=1024, tn=512, tk=1024):
    """o = act(x @ w + b).  x/w are bf16 (weights pre-cast at init), f32 VMEM
    accumulator, reduction axis last.  tm defaults to full M (<=1024 rows) so
    every weight block is streamed from HBM exactly once."""
    M, K = x2d.shape
    N = w.shape[1]
    tm, tn, tk = _pick_tile(M, tm), _pick_tile(N, tn), _pick_tile(K, tk)
    if x2d.dtype != jnp.bfloat16:
        x2d = x2d.astype(jnp.bfloat16)
    return pl.pallas_call(
        functools.partial(_linear_kernel, act=act),
        out_shape=jax.ShapeDtypeStruct((M, N), out_dtype),
        grid_spec=pltpu.PrefetchScalarGridSpec(
            num_scalar_prefetch=0,
            grid=(M // tm, N // tn, K // tk),
            in_specs=[
                pl.BlockSpec((tm, tk), lambda i, j, k: (i, k)),
                pl.BlockSpec((tk, tn), lambda i, j, k: (k, j)),
                pl.BlockSpec((1, tn), lambda i, j, k: (0, j)),
            ],
            out_specs=pl.BlockSpec((tm, tn), lambda i, j, k: (i, j)),
            scratch_shapes=[pltpu.VMEM((tm, tn), jnp.float32)],
        ),
        compiler_params=pltpu.CompilerParams(
            dimension_semantics=("parallel", "parallel", "arbitrary"),
            vmem_limit_bytes=_VMEM_LIMIT),
    )(x2d, w, b.reshape(1, N))


def _linear_add_ln_kernel(x_ref, w_ref, b_ref, r_ref, g_ref, bb_ref,
                          o_ref, acc_ref, *, eps):
    k = pl.program_id(1)

    @pl.when(k == 0)
    def _():
        acc_ref[...] = jnp.zeros_like(acc_ref)

    acc_ref[...] += jnp.dot(x_ref[...], w_ref[...],
                            preferred_element_type=jnp.float32)

    @pl.when(k == pl.num_programs(1) - 1)
    def _():
        y = acc_ref[...] + b_ref[...] + r_ref[...].astype(jnp.float32)
        mu = jnp.mean(y, axis=-1, keepdims=True)
        var = jnp.mean(jnp.square(y - mu), axis=-1, keepdims=True)
        o_ref[...] = ((y - mu) * jax.lax.rsqrt(var + eps) * g_ref[...]
                      + bb_ref[...]).astype(o_ref.dtype)


def linear_add_layernorm(x2d, w, b, res2d, gamma, beta, eps=1e-12,
                         out_dtype=jnp.bfloat16, tm=1024, tk=1024):
    """o = LayerNorm(x @ w + b + res).  N (=hidden) kept whole so the LN
    reduction runs in the matmul epilogue; K tiled, f32 accumulator; the
    residual block is resident across K steps (index_map independent of k)."""
    M, K = x2d.shape
    N = w.shape[1]
    tm, tk = _pick_tile(M, tm), _pick_tile(K, tk)
    return pl.pallas_call(
        functools.partial(_linear_add_ln_kernel, eps=eps),
        out_shape=jax.ShapeDtypeStruct((M, N), out_dtype),
        grid_spec=pltpu.PrefetchScalarGridSpec(
            num_scalar_prefetch=0,
            grid=(M // tm, K // tk),
            in_specs=[
                pl.BlockSpec((tm, tk), lambda i, k: (i, k)),
                pl.BlockSpec((tk, N), lambda i, k: (k, 0)),
                pl.BlockSpec((1, N), lambda i, k: (0, 0)),
                pl.BlockSpec((tm, N), lambda i, k: (i, 0)),
                pl.BlockSpec((1, N), lambda i, k: (0, 0)),
                pl.BlockSpec((1, N), lambda i, k: (0, 0)),
            ],
            out_specs=pl.BlockSpec((tm, N), lambda i, k: (i, 0)),
            scratch_shapes=[pltpu.VMEM((tm, N), jnp.float32)],
        ),
        compiler_params=pltpu.CompilerParams(
            dimension_semantics=("parallel", "arbitrary"),
            vmem_limit_bytes=_VMEM_LIMIT),
    )(x2d, w, b.reshape(1, N), res2d,
      gamma.reshape(1, N), beta.reshape(1, N))


def _layernorm_kernel(x_ref, g_ref, b_ref, o_ref, *, eps):
    x = x_ref[...].astype(jnp.float32)
    mu = jnp.mean(x, axis=-1, keepdims=True)
    var = jnp.mean(jnp.square(x - mu), axis=-1, keepdims=True)
    o_ref[...] = ((x - mu) * jax.lax.rsqrt(var + eps) * g_ref[...]
                  + b_ref[...]).astype(o_ref.dtype)


def layernorm(x2d, gamma, beta, eps=1e-12, out_dtype=jnp.bfloat16, tm=1024):
    M, H = x2d.shape
    tm = _pick_tile(M, tm)
    return pl.pallas_call(
        functools.partial(_layernorm_kernel, eps=eps),
        out_shape=jax.ShapeDtypeStruct((M, H), out_dtype),
        grid_spec=pltpu.PrefetchScalarGridSpec(
            num_scalar_prefetch=0,
            grid=(M // tm,),
            in_specs=[
                pl.BlockSpec((tm, H), lambda i: (i, 0)),
                pl.BlockSpec((1, H), lambda i: (0, 0)),
                pl.BlockSpec((1, H), lambda i: (0, 0)),
            ],
            out_specs=pl.BlockSpec((tm, H), lambda i: (i, 0)),
        ),
        compiler_params=pltpu.CompilerParams(
            dimension_semantics=("parallel",),
            vmem_limit_bytes=_VMEM_LIMIT),
    )(x2d, gamma.reshape(1, H), beta.reshape(1, H))


def _attention_kernel(qkv_ref, m_ref, o_ref, *, hg, dh, scale):
    """One (batch, head-group) block.  The QKV block layout is
    [Q_h0..Q_h{hg-1} | K_h0.. | V_h0..]; per-head processing is plain 2-D
    matmuls on column slices -> no (S, nh, dh) reshapes/transposes in VMEM."""
    gd = hg * dh
    qkv = qkv_ref[0]                                    # (S, 3*gd) bf16
    mask = m_ref[0]                                     # (1, S)  f32 additive
    parts = []
    for j in range(hg):                                 # static, small loop
        q = qkv[:, j * dh:(j + 1) * dh]
        k = qkv[:, gd + j * dh:gd + (j + 1) * dh]
        v = qkv[:, 2 * gd + j * dh:2 * gd + (j + 1) * dh]
        s = jax.lax.dot_general(q, k, (((1,), (1,)), ((), ())),
                                preferred_element_type=jnp.float32) * scale
        s = s + mask
        s = s - jnp.max(s, axis=-1, keepdims=True)
        p = jnp.exp(s)
        p = p / jnp.sum(p, axis=-1, keepdims=True)      # exact div (parity)
        parts.append(jnp.dot(p.astype(v.dtype), v,
                             preferred_element_type=jnp.float32))
    o_ref[0] = jnp.concatenate(parts, axis=-1).astype(o_ref.dtype)


def attention(qkv3d, mask_add, nh, hg):
    """qkv3d: (B, S, 3H) fused Q|K|V in per-head-group layout (bf16);
    mask_add: (B, 1, S) additive key mask."""
    B, S, H3 = qkv3d.shape
    H = H3 // 3
    dh = H // nh
    gd = hg * dh
    scale = 1.0 / math.sqrt(dh)
    # TODO(synk): for S >= 256-512 switch to a KV-tiled online-softmax (flash)
    # form with m/l/acc VMEM scratch (mandatory on v7x's 64 MiB VMEM).
    return pl.pallas_call(
        functools.partial(_attention_kernel, hg=hg, dh=dh, scale=scale),
        out_shape=jax.ShapeDtypeStruct((B, S, H), jnp.bfloat16),
        grid=(B, nh // hg),
        in_specs=[
            pl.BlockSpec((1, S, 3 * gd), lambda b, g: (b, 0, g)),
            pl.BlockSpec((1, 1, S), lambda b, g: (b, 0, 0)),
        ],
        out_specs=pl.BlockSpec((1, S, gd), lambda b, g: (b, 0, g)),
        compiler_params=pltpu.CompilerParams(
            dimension_semantics=("parallel", "parallel"),
            vmem_limit_bytes=_VMEM_LIMIT),
    )(qkv3d, mask_add)


def _pooler_cls_loss_kernel(x_ref, wp_ref, bp_ref, wc_ref, bc_ref, y_ref,
                            logits_ref, loss_ref):
    pooled = jnp.tanh(jnp.dot(x_ref[...], wp_ref[...],
                              preferred_element_type=jnp.float32) + bp_ref[...])
    # TODO(synk): nn.Dropout(0.3) on the pooled output is identity in eval mode.
    logits = (jnp.dot(pooled.astype(wc_ref.dtype), wc_ref[...],
                      preferred_element_type=jnp.float32) + bc_ref[...])
    logits_ref[...] = logits
    y = y_ref[...]
    # numerically stable BCEWithLogits, mean reduction
    loss = (jnp.maximum(logits, 0.0) - logits * y
            + jnp.log1p(jnp.exp(-jnp.abs(logits))))
    cnt = float(logits_ref.shape[0] * logits_ref.shape[1])
    loss_ref[...] = jnp.sum(loss, keepdims=True) * (1.0 / cnt)


def pooler_classifier_loss(cls2d, wp, bp, wc, bc, labels):
    B, H = cls2d.shape
    NL = wc.shape[1]
    logits, loss = pl.pallas_call(
        _pooler_cls_loss_kernel,
        out_shape=(jax.ShapeDtypeStruct((B, NL), jnp.float32),
                   jax.ShapeDtypeStruct((1, 1), jnp.float32)),
    )(cls2d, wp, bp.reshape(1, H), wc, bc.reshape(1, NL), labels)
    return logits, loss[0, 0]


def _pooler_cls_kernel(x_ref, wp_ref, bp_ref, wc_ref, bc_ref, logits_ref):
    pooled = jnp.tanh(jnp.dot(x_ref[...], wp_ref[...],
                              preferred_element_type=jnp.float32) + bp_ref[...])
    logits_ref[...] = (jnp.dot(pooled.astype(wc_ref.dtype), wc_ref[...],
                               preferred_element_type=jnp.float32) + bc_ref[...])


def pooler_classifier(cls2d, wp, bp, wc, bc):
    B, H = cls2d.shape
    NL = wc.shape[1]
    return pl.pallas_call(
        _pooler_cls_kernel,
        out_shape=jax.ShapeDtypeStruct((B, NL), jnp.float32),
    )(cls2d, wp, bp.reshape(1, H), wc, bc.reshape(1, NL))


# ----------------------------- Model (glue) -----------------------------

def _group_qkv(wq, wk, wv, bq, bk, bv, nh, hg):
    """Re-pack fused QKV weight columns per head-group: [Q_g | K_g | V_g]
    blocks so each group is one contiguous column slice of the QKV output."""
    H = wq.shape[0]
    dh = H // nh
    gd = hg * dh
    w_parts, b_parts = [], []
    for g in range(nh // hg):
        sl = slice(g * gd, (g + 1) * gd)
        w_parts += [wq[:, sl], wk[:, sl], wv[:, sl]]
        b_parts += [bq[sl], bk[sl], bv[sl]]
    return jnp.concatenate(w_parts, axis=1), jnp.concatenate(b_parts)


def init_params(key, cfg):
    H, I, V = cfg["hidden"], cfg["inter"], cfg["vocab"]
    P, L, NL = cfg["max_pos"], cfg["layers"], cfg["num_labels"]
    nh = cfg["heads"]
    hg = _heads_per_group(nh, H // nh)
    keys = iter(jax.random.split(key, 128))

    def nrm(shape, dtype=jnp.bfloat16):
        return (0.02 * jax.random.normal(next(keys), shape, jnp.float32)).astype(dtype)

    params = {
        # weights pre-cast to bf16 once (no per-call converts); biases/LN f32
        "word_emb": nrm((V, H)),
        "pos_emb": nrm((P, H)),
        "type_emb": nrm((2, H)),
        "emb_ln_g": jnp.ones((H,), jnp.float32),
        "emb_ln_b": jnp.zeros((H,), jnp.float32),
        "layers": [],
        "pooler_w": nrm((H, H)),
        "pooler_b": jnp.zeros((H,), jnp.float32),
        "cls_w": nrm((H, NL)),
        "cls_b": jnp.zeros((NL,), jnp.float32),
    }
    for _ in range(L):
        wq, wk, wv = (nrm((H, H), jnp.float32), nrm((H, H), jnp.float32),
                      nrm((H, H), jnp.float32))
        bq = bk = bv = jnp.zeros((H,), jnp.float32)
        w_qkv, b_qkv = _group_qkv(wq, wk, wv, bq, bk, bv, nh, hg)
        params["layers"].append(dict(
            w_qkv=w_qkv.astype(jnp.bfloat16), b_qkv=b_qkv,
            wo=nrm((H, H)), bo=jnp.zeros((H,), jnp.float32),
            ln1_g=jnp.ones((H,), jnp.float32), ln1_b=jnp.zeros((H,), jnp.float32),
            wi=nrm((H, I)), bi=jnp.zeros((I,), jnp.float32),
            wf=nrm((I, H)), bf=jnp.zeros((H,), jnp.float32),
            ln2_g=jnp.ones((H,), jnp.float32), ln2_b=jnp.zeros((H,), jnp.float32),
        ))
    return params


def bert_multilabel_forward(params, input_ids, attention_mask, labels, cfg):
    B, S = input_ids.shape
    H = cfg["hidden"]
    nh = cfg["heads"]
    hg = _heads_per_group(nh, H // nh)

    # --- embeddings: gathers stay in XLA; the sum is emitted in bf16 so the
    # LayerNorm kernel streams half the bytes of an f32 input.
    # TODO(synk): token_type_ids assumed all-zero (PyTorch default behaviour).
    emb = (params["word_emb"][input_ids]
           + params["pos_emb"][:S][None, :, :]
           + params["type_emb"][0][None, None, :])                # (B,S,H) bf16
    x2d = layernorm(emb.reshape(B * S, H),
                    params["emb_ln_g"], params["emb_ln_b"])       # (B*S,H) bf16

    # additive attention mask kept at (B, 1, S): no per-head HBM replication
    mask_add = ((1.0 - attention_mask.astype(jnp.float32)) * (-1e9))[:, None, :]

    # --- transformer layers ---
    # TODO(synk): residual stream carried in bf16 between layers (PyTorch f32).
    for lyr in params["layers"]:
        qkv = linear(x2d, lyr["w_qkv"], lyr["b_qkv"])             # (B*S,3H) bf16
        ctx = attention(qkv.reshape(B, S, 3 * H), mask_add, nh, hg)
        # TODO(synk): BERT internal dropouts are identity here (eval mode).
        x2d = linear_add_layernorm(ctx.reshape(B * S, H), lyr["wo"], lyr["bo"],
                                   x2d, lyr["ln1_g"], lyr["ln1_b"])
        inter = linear(x2d, lyr["wi"], lyr["bi"], act="gelu")     # (B*S,I) bf16
        x2d = linear_add_layernorm(inter, lyr["wf"], lyr["bf"],
                                   x2d, lyr["ln2_g"], lyr["ln2_b"])

    # --- pooler: tanh(Linear(hidden[:,0])) -> dropout(id) -> classifier (+loss)
    cls = x2d.reshape(B, S, H)[:, 0, :]                           # (B, H) bf16
    if labels is not None:
        logits, loss = pooler_classifier_loss(
            cls, params["pooler_w"], params["pooler_b"],
            params["cls_w"], params["cls_b"], labels.astype(jnp.float32))
        return {"loss": loss, "logits": logits}
    logits = pooler_classifier(cls, params["pooler_w"], params["pooler_b"],
                               params["cls_w"], params["cls_b"])
    return {"loss": None, "logits": logits}


# ----------------------------- main -----------------------------

if __name__ == "__main__":
    cfg = dict(vocab=100, hidden=32, heads=4, layers=2, inter=64,
               max_pos=16, num_labels=50)
    key = jax.random.PRNGKey(0)
    kp, ki, kl = jax.random.split(key, 3)

    params = init_params(kp, cfg)

    B, S = 2, 8
    input_ids = jax.random.randint(ki, (B, S), 0, cfg["vocab"], dtype=jnp.int32)
    attention_mask = jnp.ones((B, S), jnp.int32).at[1, 6:].set(0)   # ragged mask
    labels = (jax.random.uniform(kl, (B, cfg["num_labels"])) > 0.5).astype(jnp.float32)

    out = bert_multilabel_forward(params, input_ids, attention_mask, labels, cfg)
    jax.block_until_ready(out["logits"])
    jax.block_until_ready(out["loss"])
    assert out["logits"].shape == (B, cfg["num_labels"])
    assert out["loss"].shape == ()
    print("KERNEL_OK")
</pallas_src>

<mosaic_0001>
module attributes {stable_mosaic.version = 11 : i64} {
  func.func @_layernorm_kernel(%arg0: i32, %arg1: memref<16x32xbf16, #tpu.memory_space<vmem>>, %arg2: memref<1x32xf32, #tpu.memory_space<vmem>>, %arg3: memref<1x32xf32, #tpu.memory_space<vmem>>, %arg4: memref<16x32xbf16, #tpu.memory_space<vmem>>) attributes {dimension_semantics = [#tpu.dimension_semantics<parallel>], iteration_bounds = array<i64: 1>, scalar_prefetch = 0 : i64, scratch_operands = 0 : i64, tpu.core_type = #tpu.core_type<tc>, window_params = [{transform_indices = @transform_0, window_bounds = array<i64: 16, 32>}, {pipeline_mode = #tpu.pipeline_mode<synchronous>, transform_indices = @transform_1, window_bounds = array<i64: 1, 32>}, {pipeline_mode = #tpu.pipeline_mode<synchronous>, transform_indices = @transform_2, window_bounds = array<i64: 1, 32>}, {transform_indices = @transform_3, window_bounds = array<i64: 16, 32>}]} {
    %c0 = arith.constant 0 : index
    %c0_0 = arith.constant 0 : index
    %0 = vector.load %arg1[%c0, %c0_0] : memref<16x32xbf16, #tpu.memory_space<vmem>>, vector<16x32xbf16>
    %1 = arith.extf %0 : vector<16x32xbf16> to vector<16x32xf32>
    %cst = arith.constant dense<0.000000e+00> : vector<16xf32>
    %2 = vector.multi_reduction <add>, %1, %cst [1] : vector<16x32xf32> to vector<16xf32>
    %3 = vector.shape_cast %2 : vector<16xf32> to vector<16x1xf32>
    %cst_1 = arith.constant 3.200000e+01 : f32
    %4 = vector.broadcast %cst_1 : f32 to vector<16x1xf32>
    %5 = arith.divf %3, %4 : vector<16x1xf32>
    %6 = vector.broadcast %5 : vector<16x1xf32> to vector<16x32xf32>
    %7 = arith.subf %1, %6 : vector<16x32xf32>
    %8 = arith.mulf %7, %7 : vector<16x32xf32>
    %cst_2 = arith.constant dense<0.000000e+00> : vector<16xf32>
    %9 = vector.multi_reduction <add>, %8, %cst_2 [1] : vector<16x32xf32> to vector<16xf32>
    %10 = vector.shape_cast %9 : vector<16xf32> to vector<16x1xf32>
    %cst_3 = arith.constant 3.200000e+01 : f32
    %11 = vector.broadcast %cst_3 : f32 to vector<16x1xf32>
    %12 = arith.divf %10, %11 : vector<16x1xf32>
    %13 = vector.broadcast %5 : vector<16x1xf32> to vector<16x32xf32>
    %14 = arith.subf %1, %13 : vector<16x32xf32>
    %cst_4 = arith.constant 9.99999996E-13 : f32
    %15 = vector.broadcast %cst_4 : f32 to vector<16x1xf32>
    %16 = arith.addf %12, %15 : vector<16x1xf32>
    %17 = math.rsqrt %16 : vector<16x1xf32>
    %18 = vector.broadcast %17 : vector<16x1xf32> to vector<16x32xf32>
    %19 = arith.mulf %14, %18 : vector<16x32xf32>
    %c0_5 = arith.constant 0 : index
    %c0_6 = arith.constant 0 : index
    %20 = vector.load %arg2[%c0_5, %c0_6] : memref<1x32xf32, #tpu.memory_space<vmem>>, vector<1x32xf32>
    %21 = vector.broadcast %20 : vector<1x32xf32> to vector<16x32xf32>
    %22 = arith.mulf %19, %21 : vector<16x32xf32>
    %c0_7 = arith.constant 0 : index
    %c0_8 = arith.constant 0 : index
    %23 = vector.load %arg3[%c0_7, %c0_8] : memref<1x32xf32, #tpu.memory_space<vmem>>, vector<1x32xf32>
    %24 = vector.broadcast %23 : vector<1x32xf32> to vector<16x32xf32>
    %25 = arith.addf %22, %24 : vector<16x32xf32>
    %26 = arith.truncf %25 : vector<16x32xf32> to vector<16x32xbf16>
    %c0_9 = arith.constant 0 : index
    %c0_10 = arith.constant 0 : index
    %27 = vector.load %arg4[%c0_9, %c0_10] : memref<16x32xbf16, #tpu.memory_space<vmem>>, vector<16x32xbf16>
    tpu.vector_store %arg4[%c0_9, %c0_10], %26 {strides = array<i32>} : memref<16x32xbf16, #tpu.memory_space<vmem>>, vector<16x32xbf16>,
    return
  }
  func.func @transform_0(%arg0: i32) -> (i32, i32) {
    %c0_i32 = arith.constant 0 : i32
    %c0_i32_0 = arith.constant 0 : i32
    return %arg0, %c0_i32 : i32, i32
  }
  func.func @transform_1(%arg0: i32) -> (i32, i32) {
    %c0_i32 = arith.constant 0 : i32
    %c0_i32_0 = arith.constant 0 : i32
    %c0_i32_1 = arith.constant 0 : i32
    return %c0_i32, %c0_i32_0 : i32, i32
  }
  func.func @transform_2(%arg0: i32) -> (i32, i32) {
    %c0_i32 = arith.constant 0 : i32
    %c0_i32_0 = arith.constant 0 : i32
    %c0_i32_1 = arith.constant 0 : i32
    return %c0_i32, %c0_i32_0 : i32, i32
  }
  func.func @transform_3(%arg0: i32) -> (i32, i32) {
    %c0_i32 = arith.constant 0 : i32
    %c0_i32_0 = arith.constant 0 : i32
    return %arg0, %c0_i32 : i32, i32
  }
}

</mosaic_0001>

<bundles_post_ra>
// kernel: tpu_custom_call.1
= control target key start
LH: loop header
LB: loop body
LE: loop exit
PB: predicated region body
PF: predicated region fallthrough
CT: control target
= control target key end

     0   :  { %8 = vsyncpa [#allocation3], 0  ;;  %s237_s0 = inlined_call_operand.hbm [shape: bf16[16,32], index: 0, kind: input, shape index: {}]   ;;  %s238_s1 = inlined_call_operand.vmem [shape: f32[1,32], index: 1, kind: input, shape index: {}]   ;;  %s239_s2 = inlined_call_operand.vmem [shape: f32[1,32], index: 2, kind: input, shape index: {}]   ;;  %s240_s3 = inlined_call_operand.hbm [shape: bf16[16,32], index: 3, kind: output, shape index: {}]  }
   0x1   :  { %9 = vsyncpa [#allocation4], 0  ;;  %s173_s12 = smov [#allocation2]   ;;  %s125_s16 = scalar_lea.hbm %s237_s0, 128 }
   0x2   :  { %s15_s13 = sshll.u32 %s173_s12, 4  ;;  %p126_p0 = scmp.ne.s32.totalorder %s237_s0, %s125_s16  ;;  %s16_s13 = int_to_ptr.vmem [resolvable:$true] %s15_s13 }
   0x3   :  { %p129_p1 = scmp.lt.u32.totalorder %s125_s16, %s237_s0 }
   0x5   :  { %p131_p2 = pnand %p129_p1, %p126_p0 }
   0x7   :  { %134 = shalt.err (!%p131_p2)
}
   0x8   :  { %s135_s21 = scalar_lea.vmem %s16_s13, 128  ;;  %p140_p4 = scmp.lt.s32.totalorder %s16_s13, %s16_s13 }
   0x9   :  { %p136_p3 = scmp.ne.s32.totalorder %s16_s13, %s135_s21  ;;  %p141_p5 = scmp.lt.s32.totalorder %s135_s21, %s135_s21 }
   0xb   :  { %p142_p6 = por %p141_p5, %p140_p4 }
   0xd   :  { %p143_p7 = pnand %p142_p6, %p136_p3 }
   0xf   :  { %146 = shalt.err (!%p143_p7)
}
  0x10   :  { %s174_s22 = smov 64   ;;  %s175_s23 = smov 4  }
  0x11   :  { %21 = dma.hbm_to_vmem [thread:$0]  %s237_s0, 128, %s16_s13, [#allocation3], %s174_s22, %s174_s22, %s175_s23  }
  0x12   :  { %169 = dma.done.wait [#allocation3], 128  }
  0x13   :  { %170 = vsyncadd [#allocation3], 4294967168  ;;  %v114_v0 = vld [vmem:[#allocation2] sm:$0xff]   ;;  %vm33_vm0 = vcmask 261120   ;;  %vm87_vm1 = vcmask 257024   ;;  %s176_s29 = smov [#allocation5]  }
  0x14   :  { %v115_v1 = vunpack.c.l.bf16 %v114_v0  ;;  %v116_v2 = vunpack.c.h.bf16 %v114_v0  ;;  %v107_v22 = vld [vmem:[%s238_s1] ss:$0 sm:$0xff]  ;;  %s95_s30 = sshll.u32 %s176_s29, 4  ;;  %s96_s30 = int_to_ptr.vmem [resolvable:$true] %s95_s30 }
  0x15   :  { %v108_v24 = vld [vmem:[%s239_s2] ss:$0 sm:$0xff]  ;;  %s147_s1 = scalar_lea.vmem %s96_s30, 128  ;;  %p152_p9 = scmp.lt.s32.totalorder %s96_s30, %s96_s30 }
  0x16   :  { %v34_v3 = vsel %vm33_vm0, %v115_v1, 0.0  ;;  %v37_v4 = vsel %vm33_vm0, %v116_v2, 0.0  ;;  %p148_p8 = scmp.ne.s32.totalorder %s96_s30, %s147_s1  ;;  %p153_p10 = scmp.lt.s32.totalorder %s147_s1, %s147_s1 }
  0x17   :  { %35 = vadd.xlane.f32.xlu0 %v34_v3 }
  0x18   :  { %p154_p11 = por %p153_p10, %p152_p9 }
  0x1a   :  { %p155_p12 = pnand %p154_p11, %p148_p8 }
  0x1b   :  { %38 = vadd.xlane.f32.xlu0 %v37_v4 }
  0xa4   :  { %v36_v5 = vpop.xlane.xlu0 %35 }
  0xa5   :  { %v41_v6 = vmul.f32 0.03125, %v36_v5 }
  0xa7   :  { %v43_v7 = vsub.f32 %v115_v1, %v41_v6 }
  0xa8   :  { %v39_v8 = vpop.xlane.xlu0 %38 }
  0xa9   :  { %v42_v9 = vmul.f32 0.03125, %v39_v8  ;;  %v45_v10 = vmul.f32 %v43_v7, %v43_v7 }
  0xab   :  { %v44_v11 = vsub.f32 %v116_v2, %v42_v9  ;;  %v47_v12 = vsel %vm33_vm0, %v45_v10, 0.0 }
  0xac   :  { %48 = vadd.xlane.f32.xlu1 %v47_v12 }
  0xad   :  { %v46_v13 = vmul.f32 %v44_v11, %v44_v11 }
  0xaf   :  { %v50_v14 = vsel %vm33_vm0, %v46_v13, 0.0 }
  0xb0   :  { %51 = vadd.xlane.f32.xlu1 %v50_v14 }
 0x139   :  { %v49_v15 = vpop.xlane.xlu1 %48 }
 0x13a   :  { %v53_v16 = vmul.f32 0.03125, %v49_v15 }
 0x13c   :  { %v55_v17 = vadd.f32 1e-12, %v53_v16 }
 0x13d   :  { %v52_v18 = vpop.xlane.xlu1 %51 }
 0x13e   :  { %121 = vrsqrt.f32 %v55_v17  ;;  %v54_v19 = vmul.f32 0.03125, %v52_v18 }
 0x140   :  { %v56_v20 = vadd.f32 1e-12, %v54_v19 }
 0x142   :  { %123 = vrsqrt.f32 %v56_v20 }
 0x148   :  { %v122_v21 = vpop.eup %121 }
 0x149   :  { %v59_v23 = vmul.f32 %v122_v21, %v43_v7 }
 0x14b   :  { %v68_v25 = vmul.f32 %v107_v22, %v59_v23 }
 0x14c   :  { %v124_v26 = vpop.eup %123 }
 0x14d   :  { %v60_v27 = vmul.f32 %v124_v26, %v44_v11  ;;  %v77_v28 = vadd.f32 %v108_v24, %v68_v25 }
 0x14f   :  { %v69_v29 = vmul.f32 %v107_v22, %v60_v27  ;;  %v111_v30 = vpack.c.bf16 %v77_v28, %v77_v28 }
 0x151   :  { %v78_v31 = vadd.f32 %v108_v24, %v69_v29  ;;  %88 = vst.msk [vmem:[#allocation5] sm:$0xf] %vm87_vm1, %v111_v30 }
 0x153   :  { %v112_v32 = vpack.c.bf16 %v78_v31, %v78_v31 }
 0x155   :  { %89 = vst.msk [vmem:[#allocation5 + $0x4] sm:$0xf] %vm87_vm1, %v112_v32 }
 0x156   :  { %158 = shalt.err (!%p155_p12)
}
 0x157   :  { %s159_s5 = scalar_lea.hbm %s240_s3, 128 }
 0x158   :  { %p160_p13 = scmp.ne.s32.totalorder %s240_s3, %s159_s5  ;;  %p163_p0 = scmp.lt.u32.totalorder %s159_s5, %s240_s3 }
 0x15a   :  { %p165_p1 = pnand %p163_p0, %p160_p13 }
 0x15c   :  { %168 = shalt.err (!%p165_p1)
}
 0x15d   :  { %101 = dma.vmem_to_hbm [thread:$0]  %s96_s30, 128, %s240_s3, [#allocation4], %s174_s22, %s174_s22, %s175_s23  }
 0x15e   :  { %171 = dma.done.wait [#allocation4], 128  }
 0x15f   :  { %172 = vsyncadd [#allocation4], 4294967168 }
 0x160   :  { %105 = vsyncpa [#allocation3], 1 }
 0x161   :  { %106 = vsyncpa [#allocation4], 1 }

</bundles_post_ra>
